<compile_context>
chip_gen: v7x
topology: tpu7x:2x2x1
jax: 0.10.0
libtpu: 0.0.40
codegen_flags: <defaults>
</compile_context>

<pallas_src>
import jax
import jax.numpy as jnp
from jax.experimental import pallas as pl
from jax.experimental.pallas import tpu as pltpu


# ---------------------------------------------------------------------------
# Kernel: one grid step handles (batch b, lane tile c, row tile i).
# z block: (Ti, Tc); mask block: (8, Tc) sublane-replicated, float32.
# ---------------------------------------------------------------------------
def _dropout_rowwise_kernel(z_ref, m_ref, o_ref):
    z = z_ref[...]                          # (Ti, Tc), z.dtype
    m = m_ref[...]                          # (8,  Tc), float32 (exact 1/(1-p))
    ti, tc = z.shape
    zr = z.reshape(ti // 8, 8, tc)          # layout-free split of the sublane dim
    out = zr * m[None]                      # whole-vreg vmuls (f32 if z is bf16)
    o_ref[...] = out.reshape(ti, tc).astype(o_ref.dtype)


# ---------------------------------------------------------------------------
# Tiling / VMEM sizing helpers
# ---------------------------------------------------------------------------
def _round_up(x, m):
    return (x + m - 1) // m * m


def _budget_for_backend():
    """(per-block byte budget, scoped VMEM limit) chosen per TPU generation."""
    try:
        cap = pltpu.get_tpu_info().vmem_capacity_bytes
    except Exception:
        cap = 64 << 20                       # conservative (v7x-sized) default
    if cap >= (96 << 20):                    # v5e / v6e: 128 MiB VMEM per core
        return 8 << 20, 64 << 20
    return 5 << 20, 44 << 20                 # v7x (64 MiB) or unknown backend


def _pick_tiles(n_rows, nc, itemsize, budget_bytes):
    """Row tile (multiple of 8) and lane tile (full NC, or a multiple of 128)
    whose product stays under budget_bytes. Ragged edges handled by cdiv grid."""
    row_bytes = nc * itemsize
    if 8 * row_bytes <= budget_bytes:
        # Lane-dense: keep the full NC per block, tile only the row axis.
        max_rows = max(8, (budget_bytes // row_bytes) // 8 * 8)
        ti = min(_round_up(n_rows, 8), max_rows)
        return ti, nc
    # A single 8-row slab exceeds the budget: tile the lane axis as well.
    max_lanes = max(128, (budget_bytes // (8 * itemsize)) // 128 * 128)
    tc = min(_round_up(nc, 128), max_lanes)
    return 8, tc


# ---------------------------------------------------------------------------
# Wrapper
# ---------------------------------------------------------------------------
def dropout_rowwise(z, p, seed, *, training=True):
    """Rowwise dropout on a (B, N_i, N_j, c_z) pair representation."""
    if not training or p == 0.0:
        return z
    assert 0.0 < p < 1.0

    B, Ni, Nj, C = z.shape
    NC = Nj * C
    keep_prob = 1.0 - float(p)

    # Row-shared Bernoulli mask, computed once per call (O(B * Nj * c_z) work,
    # ~1/Ni of the tensor). float32 so 1/(1-p) is exact even for bf16 inputs.
    key = jax.random.PRNGKey(seed)
    keep = jax.random.bernoulli(key, p=keep_prob, shape=(B, 1, NC))
    mask = keep.astype(jnp.float32) * (1.0 / keep_prob)          # (B, 1, NC)
    mask8 = jnp.broadcast_to(mask, (B, 8, NC))                   # sublane-replicated

    z2 = z.reshape(B, Ni, NC)                                    # contiguous, lane-dense

    budget, vmem_limit = _budget_for_backend()
    Ti, Tc = _pick_tiles(Ni, NC, z.dtype.itemsize, budget)
    # Grid order (b, c, i): the i axis is fastest, so the mask block index
    # (b, 0, c) is unchanged across row tiles -> fetched once per (batch, c-tile).
    grid = (B, pl.cdiv(NC, Tc), pl.cdiv(Ni, Ti))

    out2 = pl.pallas_call(
        _dropout_rowwise_kernel,
        out_shape=jax.ShapeDtypeStruct((B, Ni, NC), z.dtype),
        grid=grid,
        in_specs=[
            pl.BlockSpec((None, Ti, Tc), lambda b, c, i: (b, i, c)),
            pl.BlockSpec((None, 8, Tc), lambda b, c, i: (b, 0, c)),
        ],
        out_specs=pl.BlockSpec((None, Ti, Tc), lambda b, c, i: (b, i, c)),
        compiler_params=pltpu.CompilerParams(
            dimension_semantics=("parallel", "parallel", "parallel"),
            vmem_limit_bytes=vmem_limit,
        ),
    )(z2, mask8)

    return out2.reshape(B, Ni, Nj, C)


# ---------------------------------------------------------------------------
if __name__ == "__main__":
    B, N, c_z = 2, 8, 32
    p = 0.25
    seed = 1234

    key = jax.random.PRNGKey(0)
    z = jax.random.normal(key, (B, N, N, c_z), jnp.float32)

    out = jax.block_until_ready(dropout_rowwise(z, p, seed, training=True))
    # Same seed on an all-ones input recovers the mask itself (wrapper PRNG is
    # functional, so the mask is deterministic across calls with the same seed).
    mask = jax.block_until_ready(
        dropout_rowwise(jnp.ones_like(z), p, seed, training=True))

    assert out.shape == z.shape

    # 1) rowwise: mask is constant across the row (i) axis.
    assert jnp.array_equal(mask, jnp.broadcast_to(mask[:, :1], mask.shape))

    # 2) mask values are exactly 0 or 1 / (1 - p).
    scale = 1.0 / (1.0 - p)
    ok = jnp.logical_or(mask == 0.0, jnp.abs(mask - scale) < 1e-5)
    assert bool(jnp.all(ok))

    # 3) output equals z * mask (forward semantics).
    assert jnp.allclose(out, z * mask, atol=1e-6, rtol=1e-6)

    # 4) keep fraction is statistically sane (512 independent Bernoulli draws).
    keep_frac = float(jnp.mean(mask > 0))
    assert 0.5 < keep_frac < 0.95, keep_frac

    # 5) eval mode / p == 0 are identity passthroughs.
    assert jnp.array_equal(dropout_rowwise(z, p, seed, training=False), z)
    assert jnp.array_equal(dropout_rowwise(z, 0.0, seed, training=True), z)

    print("KERNEL_OK")
</pallas_src>

<mosaic_0001>
module attributes {stable_mosaic.version = 11 : i64} {
  func.func @_dropout_rowwise_kernel(%arg0: i32, %arg1: i32, %arg2: i32, %arg3: memref<1x8x256xf32, #tpu.memory_space<vmem>>, %arg4: memref<1x8x256xf32, #tpu.memory_space<vmem>>, %arg5: memref<1x8x256xf32, #tpu.memory_space<vmem>>) attributes {dimension_semantics = [#tpu.dimension_semantics<parallel>, #tpu.dimension_semantics<parallel>, #tpu.dimension_semantics<parallel>], iteration_bounds = array<i64: 2, 1, 1>, scalar_prefetch = 0 : i64, scratch_operands = 0 : i64, tpu.core_type = #tpu.core_type<tc>, window_params = [{transform_indices = @transform_0, window_bounds = array<i64: 1, 8, 256>}, {transform_indices = @transform_1, window_bounds = array<i64: 1, 8, 256>}, {transform_indices = @transform_2, window_bounds = array<i64: 1, 8, 256>}]} {
    %c0 = arith.constant 0 : index
    %c0_0 = arith.constant 0 : index
    %c0_1 = arith.constant 0 : index
    %0 = vector.load %arg3[%c0, %c0_0, %c0_1] : memref<1x8x256xf32, #tpu.memory_space<vmem>>, vector<1x8x256xf32>
    %1 = vector.shape_cast %0 : vector<1x8x256xf32> to vector<8x256xf32>
    %c0_2 = arith.constant 0 : index
    %c0_3 = arith.constant 0 : index
    %c0_4 = arith.constant 0 : index
    %2 = vector.load %arg4[%c0_2, %c0_3, %c0_4] : memref<1x8x256xf32, #tpu.memory_space<vmem>>, vector<1x8x256xf32>
    %3 = vector.shape_cast %2 : vector<1x8x256xf32> to vector<8x256xf32>
    %4 = vector.shape_cast %1 : vector<8x256xf32> to vector<1x8x256xf32>
    %5 = vector.shape_cast %3 : vector<8x256xf32> to vector<1x8x256xf32>
    %6 = arith.mulf %4, %5 : vector<1x8x256xf32>
    %7 = vector.shape_cast %6 : vector<1x8x256xf32> to vector<8x256xf32>
    %c0_5 = arith.constant 0 : index
    %c0_6 = arith.constant 0 : index
    %c0_7 = arith.constant 0 : index
    %8 = vector.load %arg5[%c0_5, %c0_6, %c0_7] : memref<1x8x256xf32, #tpu.memory_space<vmem>>, vector<1x8x256xf32>
    %9 = vector.shape_cast %8 : vector<1x8x256xf32> to vector<8x256xf32>
    %10 = vector.shape_cast %7 : vector<8x256xf32> to vector<1x8x256xf32>
    tpu.vector_store %arg5[%c0_5, %c0_6, %c0_7], %10 {strides = array<i32>} : memref<1x8x256xf32, #tpu.memory_space<vmem>>, vector<1x8x256xf32>,
    return
  }
  func.func @transform_0(%arg0: i32, %arg1: i32, %arg2: i32) -> (i32, i32, i32) {
    %c0_i32 = arith.constant 0 : i32
    return %arg0, %arg2, %arg1 : i32, i32, i32
  }
  func.func @transform_1(%arg0: i32, %arg1: i32, %arg2: i32) -> (i32, i32, i32) {
    %c0_i32 = arith.constant 0 : i32
    %c0_i32_0 = arith.constant 0 : i32
    return %arg0, %c0_i32, %arg1 : i32, i32, i32
  }
  func.func @transform_2(%arg0: i32, %arg1: i32, %arg2: i32) -> (i32, i32, i32) {
    %c0_i32 = arith.constant 0 : i32
    return %arg0, %arg2, %arg1 : i32, i32, i32
  }
}

</mosaic_0001>

<bundles_post_ra>
// kernel: tpu_custom_call.1
= control target key start
LH: loop header
LB: loop body
LE: loop exit
PB: predicated region body
PF: predicated region fallthrough
CT: control target
= control target key end

     0   :  { %7 = vsyncpa [#allocation3], 0  ;;  %s855_s0 = inlined_call_operand.hbm [shape: f32[2,8,256], index: 0, kind: input, shape index: {}]   ;;  %s856_s1 = inlined_call_operand.hbm [shape: f32[2,8,256], index: 1, kind: input, shape index: {}]   ;;  %s857_s2 = inlined_call_operand.hbm [shape: f32[2,8,256], index: 2, kind: output, shape index: {}]  }
   0x1   :  { %9 = vsyncpa [#allocation3 + $0x1], 0 }
   0x2   :  { %10 = vsyncpa [#allocation6], 0 }
   0x3   :  { %12 = vsyncpa [#allocation6 + $0x1], 0 }
   0x4   :  { %13 = vsyncpa [#allocation4], 0 }
   0x5   :  { %15 = vsyncpa [#allocation4 + $0x1], 0  ;;  %s635_s9 = smov 0   ;;  %s637_s10 = smov 0  }
   0x6   :  { %s639_s11 = smov 0   ;;  %s641_s12 = smov 0  }
   0x7   :  { %s643_s13 = smov 0   ;;  %s645_s14 = smov 0  }
   0x8 LB: > { %s380_s15 = sadd.s32 4294967295, %s615_s14   ;;  %s381_s16 = sadd.s32 4294967294, %s615_s14   ;;  %s615_s14 = sphi %s645_s14, %s21_s14   ;;  %s611_s13 = sphi %s643_s13, %s877_s13   ;;  %s607_s12 = sphi %s641_s12, %s876_s12   ;;  %s603_s11 = sphi %s639_s11, %s875_s11   ;;  %s599_s10 = sphi %s637_s10, %s874_s10   ;;  %s595_s9 = sphi %s635_s9, %s873_s9  }
   0x9   : > { %s40_s17 = sadd.s32 1, %s611_s13  ;;  %s51_s18 = sadd.s32 1, %s603_s11 }
   0xa   : > { %p42_p0 = scmp.ge.s32.totalorder %s40_s17, 2  ;;  %p58_p1 = scmp.ne.s32.totalorder %s603_s11, %s599_s10 }
   0xb   : > { %p59_p2 = scmp.eq.s32.totalorder %s615_s14, 0  ;;  %p64_p3 = scmp.ne.s32.totalorder %s599_s10, %s595_s9 }
   0xc   : > { %s879_s17 = smov (%p42_p0, %s40_s17), 0  ;;  %p65_p5 = scmp.eq.s32.totalorder %s380_s15, 0 }
   0xd   : > { %p676_p4 = por %p59_p2, %p58_p1  ;;  %s44_s20 = ssub.s32 %s611_s13, %s879_s17 }
   0xe   : > { %p120_p6 = scmp.eq.s32.totalorder %s380_s15, 1  ;;  %p49_p7 = scmp.eq.s32.totalorder %s44_s20, 0 }
   0xf   : > { %p682_p8 = por %p65_p5, %p64_p3  ;;  %p126_p10 = scmp.eq.s32.totalorder %s381_s16, 1 }
  0x10   : > { %p686_p9 = por %p120_p6, %p58_p1  ;;  %p419_p13 = scmp.lt.s32.totalorder %s615_s14, 2 }
  0x11   : > { %s861_s21 = scalar_select %p682_p8, 1, 0 }
  0x12   : > { %s862_s22 = scalar_select %p686_p9, 1, 0 }
  0x13   : > { %s691_s23 = scalar_select %p49_p7, %s603_s11, %s51_s18  }
  0x14   : > { %p693_p11 = por %p126_p10, %p64_p3  ;;  %s700_s25 = sand.u32 1, %s603_s11  }
  0x15   : > { %s384_s26 = sshll.u32 %s700_s25, 4  ;;  %s399_s27 = sshll.u32 %s611_s13, 8 }
  0x16   : > { %s863_s24 = scalar_select %p693_p11, 1, 0 }
  0x17   : > { %s709_s30 = scalar_lea.hbm %s855_s0, %s399_s27  ;;  %s150_s3 = scalar_lea.vmem [#allocation2], %s384_s26 }
  0x18   : > { %s162_s4 = sshll.u32 %s150_s3, 4  ;;  %p717_p0 = pnand %p419_p13, %p676_p4  ;;  %s713_s4 = int_to_ptr.vmem [resolvable:$true] %s162_s4 }
  0x19   : > { %s147_s6 = scalar_lea.sflag [#allocation3], %s700_s25  ;;  %s469_s7 = scalar_lea.hbm %s709_s30, 256 }
  0x1a   : > { %p470_p3 = scmp.ne.s32.totalorder %s709_s30, %s469_s7  ;;  %p471_p5 = pneg %p717_p0 }
  0x1b   : > { %s474_s16 = scalar_lea.hbm %s855_s0, 512  ;;  %p475_p4 = scmp.lt.u32.totalorder %s709_s30, %s855_s0 }
  0x1c   : > { %p472_p6 = pnand %p471_p5, %p470_p3  ;;  %p476_p10 = scmp.lt.u32.totalorder %s474_s16, %s469_s7 }
  0x1d   : > { %p478_p12 = scmp.lt.u32.totalorder %s469_s7, %s709_s30 }
  0x1e   : > { %p473_p7 = pneg %p472_p6  ;;  %p477_p13 = por %p476_p10, %p475_p4 }
  0x20   : > { %p479_p1 = por %p478_p12, %p477_p13 }
  0x22   : > { %p480_p2 = pnand %p479_p1, %p473_p7 }
  0x24   : > { %483 = shalt.err (!%p480_p2)
}
  0x25   : > { %s484_s20 = scalar_lea.vmem %s713_s4, 256  ;;  %s617_s28 = smov [#allocation2]  }
  0x26   : > { %p485_p3 = scmp.ne.s32.totalorder %s713_s4, %s484_s20  ;;  %s489_s29 = sshll.u32 %s617_s28, 4  ;;  %s490_s29 = int_to_ptr.vmem [resolvable:$false] %s489_s29 }
  0x27   : > { %s491_s3 = scalar_lea.vmem %s490_s29, 512  ;;  %p492_p9 = scmp.lt.s32.totalorder %s713_s4, %s490_s29 }
  0x28   : > { %p487_p6 = pnand %p485_p3, %p471_p5  ;;  %p493_p4 = scmp.lt.s32.totalorder %s491_s3, %s484_s20 }
  0x2a   : > { %p488_p11 = pneg %p487_p6  ;;  %p494_p10 = por %p493_p4, %p492_p9 }
  0x2c   : > { %p495_p12 = pnand %p494_p10, %p488_p11 }
  0x2e   : > { %498 = shalt.err (!%p495_p12)
}
  0x2f   : > { %411 = dma.hbm_to_vmem [thread:$0]  (!%p717_p0), %s709_s30, 256, %s713_s4, %s147_s6  }
  0x30   : > { %p865_p1 = scmp.lt.s32.totalorder %s615_s14, 3  ;;  %p866_p2 = scmp.ge.s32.totalorder %s615_s14, 1 }
  0x31   : > { %s762_s16 = scalar_lea.hbm %s856_s1, %s399_s27  ;;  %s173_s18 = scalar_lea.vmem [#allocation5], %s384_s26 }
  0x32   : > { %p753_p7 = pnand %p866_p2, %p865_p1  ;;  %s183_s19 = sshll.u32 %s173_s18, 4  ;;  %s184_s19 = int_to_ptr.vmem [resolvable:$true] %s183_s19 }
  0x33   : > { %s170_s30 = scalar_lea.sflag [#allocation6], %s700_s25  ;;  %s499_s4 = scalar_lea.hbm %s762_s16, 256 }
  0x34   : > { %s867_s7 = scalar_select %p753_p7, 1, 0 }
  0x35   : > { %p500_p9 = scmp.ne.s32.totalorder %s762_s16, %s499_s4  ;;  %s504_s27 = scalar_lea.hbm %s856_s1, 512 }
  0x36   : > { %p505_p3 = scmp.lt.u32.totalorder %s762_s16, %s856_s1  ;;  %p506_p6 = scmp.lt.u32.totalorder %s504_s27, %s499_s4 }
  0x37   : > { %p502_p11 = pnand %p500_p9, %p471_p5  ;;  %p508_p10 = scmp.lt.u32.totalorder %s499_s4, %s762_s16 }
  0x38   : > { %p507_p4 = por %p506_p6, %p505_p3 }
  0x39   : > { %p503_p13 = pneg %p502_p11 }
  0x3a   : > { %p509_p12 = por %p508_p10, %p507_p4 }
  0x3c   : > { %p510_p1 = pnand %p509_p12, %p503_p13 }
  0x3e   : > { %513 = shalt.err (!%p510_p1)
}
  0x3f   : > { %s514_s25 = scalar_lea.vmem %s184_s19, 256  ;;  %s618_s26 = smov [#allocation5]  }
  0x40   : > { %p515_p2 = scmp.ne.s32.totalorder %s184_s19, %s514_s25  ;;  %s519_s3 = sshll.u32 %s618_s26, 4  ;;  %s520_s3 = int_to_ptr.vmem [resolvable:$false] %s519_s3 }
  0x41   : > { %s521_s8 = scalar_lea.vmem %s520_s3, 512  ;;  %p522_p8 = scmp.lt.s32.totalorder %s184_s19, %s520_s3 }
  0x42   : > { %p517_p9 = pnand %p515_p2, %p471_p5  ;;  %p523_p7 = scmp.lt.s32.totalorder %s521_s8, %s514_s25 }
  0x44   : > { %p518_p11 = pneg %p517_p9  ;;  %p524_p3 = por %p523_p7, %p522_p8 }
  0x46   : > { %p525_p6 = pnand %p524_p3, %p518_p11 }
  0x48   : > { %528 = shalt.err (!%p525_p6)
}
  0x49   : > { %414 = dma.hbm_to_vmem [thread:$0]  (!%p717_p0), %s762_s16, 256, %s184_s19, %s170_s30  }
  0x4a   : > { %p868_p13 = scmp.ne.s32.totalorder %s867_s7, 0 }
  0x4b   : > { %s789_s15 = sand.u32 (!%p868_p13), 1, %s599_s10   ;;  %p869_p5 = scmp.ne.s32.totalorder (!%p868_p13), %s861_s21, 0 }
  0x4c   : > { %192 = sbr.rel (%p868_p13) target bundleno = 112 (0x70), region = 28  ;;  %s391_s18 = sshll.u32 (!%p868_p13), %s789_s15, 4 }
  0x4d   : > { %s195_s4 = scalar_lea.sflag (!%p868_p13), [#allocation3], %s789_s15  ;;  %s198_s6 = scalar_lea.vmem (!%p868_p13), [#allocation2], %s391_s18 }
  0x53   : > { %582 = dma.done.wait (%p869_p5), %s195_s4, 256  }
  0x54   : > { %584 = vsyncadd (%p869_p5), %s195_s4, 4294967040  ;;  %s204_s5 = scalar_lea.sflag [#allocation6], %s789_s15  ;;  %s207_s16 = scalar_lea.vmem [#allocation5], %s391_s18 }
  0x55   : > { %586 = dma.done.wait (%p869_p5), %s204_s5, 256  }
  0x56   : > { %588 = vsyncadd (%p869_p5), %s204_s5, 4294967040  ;;  %s232_s7 = scalar_lea.vmem [#allocation7], %s391_s18  ;;  %s401_s30 = sshll.u32 %s607_s12, 8  ;;  %v236_v0 = vld [vmem:[%s198_s6] sm:$0xff]  ;;  %v237_v2 = vld [vmem:[%s198_s6 + $0x8] sm:$0xff] }
  0x57   : > { %s263_s19 = sshll.u32 %s232_s7, 4  ;;  %v238_v1 = vld [vmem:[%s207_s16] sm:$0xff]  ;;  %v239_v4 = vld [vmem:[%s207_s16 + $0x8] sm:$0xff]  ;;  %s808_s27 = scalar_lea.hbm %s857_s2, %s401_s30  ;;  %s803_s19 = int_to_ptr.vmem [resolvable:$true] %s263_s19 }
  0x58   : > { %v240_v3 = vmul.f32 %v238_v1, %v236_v0  ;;  %v241_v5 = vmul.f32 %v239_v4, %v237_v2  ;;  %s245_s28 = scalar_lea.sflag [#allocation4], %s789_s15  ;;  %s529_s12 = scalar_lea.vmem %s803_s19, 256 }
  0x59   : > { %p530_p8 = scmp.ne.s32.totalorder %s803_s19, %s529_s12  ;;  %p870_p0 = scmp.ne.s32.totalorder %s862_s22, 0 }
  0x5a   : > { %242 = vst [vmem:[%s232_s7] sm:$0xff] %v240_v3  ;;  %243 = vst [vmem:[%s232_s7 + $0x8] sm:$0xff] %v241_v5  ;;  %s619_s29 = smov [#allocation7]  }
  0x5b   : > { %p531_p7 = pnand %p530_p8, %p870_p0  ;;  %s533_s25 = sshll.u32 %s619_s29, 4  ;;  %s534_s25 = int_to_ptr.vmem [resolvable:$false] %s533_s25 }
  0x5c   : > { %s535_s26 = scalar_lea.vmem %s534_s25, 512  ;;  %p536_p10 = scmp.lt.s32.totalorder %s803_s19, %s534_s25 }
  0x5d   : > { %p532_p4 = pneg %p531_p7  ;;  %p537_p12 = scmp.lt.s32.totalorder %s535_s26, %s529_s12 }
  0x5f   : > { %p538_p1 = por %p537_p12, %p536_p10 }
  0x61   : > { %p539_p2 = pnand %p538_p1, %p532_p4 }
  0x63   : > { %542 = shalt.err (!%p539_p2)
}
  0x64   : > { %s543_s3 = scalar_lea.hbm %s808_s27, 256  ;;  %s547_s18 = scalar_lea.hbm %s857_s2, 512 }
  0x65   : > { %p544_p9 = scmp.ne.s32.totalorder %s808_s27, %s543_s3  ;;  %p548_p6 = scmp.lt.u32.totalorder %s808_s27, %s857_s2 }
  0x66   : > { %p549_p13 = scmp.lt.u32.totalorder %s547_s18, %s543_s3  ;;  %p551_p8 = scmp.lt.u32.totalorder %s543_s3, %s808_s27 }
  0x67   : > { %p545_p11 = pnand %p544_p9, %p870_p0 }
  0x68   : > { %p550_p5 = por %p549_p13, %p548_p6 }
  0x69   : > { %p546_p3 = pneg %p545_p11 }
  0x6a   : > { %p552_p7 = por %p551_p8, %p550_p5 }
  0x6c   : > { %p553_p4 = pnand %p552_p7, %p546_p3 }
  0x6e   : > { %556 = shalt.err (!%p553_p4)
}
  0x6f   : > { %406 = dma.vmem_to_hbm [thread:$0]  (%p870_p0), %s803_s19, 256, %s808_s27, %s245_s28  }
  0x70 PF: > { %s275_s5 = sand.u32 1, %s595_s9   ;;  %p871_p10 = scmp.ne.s32.totalorder %s863_s24, 0 }
  0x71   : > { %p872_p12 = scmp.ge.s32.totalorder %s615_s14, 2  ;;  %s276_s16 = scalar_lea.sflag [#allocation4], %s275_s5 }
  0x73   : > { %p416_p1 = pnand %p872_p12, %p871_p10 }
  0x75   : > { %590 = dma.done.wait (!%p416_p1), %s276_s16, 256  }
  0x76   : > { %592 = vsyncadd (!%p416_p1), %s276_s16, 4294967040  ;;  %s21_s14 = sadd.s32 1, %s615_s14   ;;  %s873_s9 = smov %s599_s10 }
  0x77   : > { %p18_p2 = scmp.ge.s32.totalorder %s21_s14, 4   ;;  %s874_s10 = smov %s603_s11 }
  0x78   : > { %s875_s11 = smov %s691_s23  ;;  %s876_s12 = smov %s611_s13 }
  0x79   : > { %s877_s13 = smov %s879_s17  ;;  %20 = sbr.rel (!%p18_p2) target bundleno = 8 (0x8), region = 86 }
  0x80   :  { %281 = vsyncpa [#allocation3], 1 }
  0x81   :  { %283 = vsyncpa [#allocation3 + $0x1], 1 }
  0x82   :  { %284 = vsyncpa [#allocation6], 1 }
  0x83   :  { %286 = vsyncpa [#allocation6 + $0x1], 1 }
  0x84   :  { %287 = vsyncpa [#allocation4], 1 }
  0x85   :  { %289 = vsyncpa [#allocation4 + $0x1], 1 }

</bundles_post_ra>
